<compile_context>
chip_gen: v7x
topology: tpu7x:2x2x1
jax: 0.10.0
libtpu: 0.0.40
codegen_flags: <defaults>
</compile_context>

<pallas_src>
import math
import functools

import jax
import jax.numpy as jnp
from jax.experimental import pallas as pl
from jax.experimental.pallas import tpu as pltpu

GATE_MULT = {"RNN": 1, "GRU": 3, "LSTM": 4}   # PyTorch weight-layout gate multiplier
EFF_GATES = {"RNN": 1, "GRU": 4, "LSTM": 4}   # packed gate blocks in the fused weight
_NEG = -1e30                                  # bias for padded vocab lanes (keep f32!)


def _round_up(x, m):
    return (x + m - 1) // m * m


def make_decoder_kernel(rnn_type, num_layers, dp):
    """grid=(T,).  Step t: x = relu(emb[token[t]]); L recurrent cells (2 MXU pushes each
    against the fused, 128-aligned gate weight); out[t] = log_softmax(x @ W_out + b_out).
    The recurrent state lives in the (L, Dp) output blocks and carries across steps."""
    D = dp
    lstm = rnn_type == "LSTM"

    def kernel(*refs):
        idx = 0
        _tok_ref = refs[idx]; idx += 1          # SMEM scalar prefetch (used by index_maps)
        emb_ref = refs[idx]; idx += 1           # (1, 1, D)  gathered embedding row
        h0_ref = refs[idx]; idx += 1            # (L, D) initial hidden
        if lstm:
            c0_ref = refs[idx]; idx += 1        # (L, D) initial cell
        w_ref = refs[idx]; idx += 1             # (L, 2D, nP) bf16 fused [W_x ; W_h]
        b_ref = refs[idx]; idx += 1             # (L, nP) f32 fused biases
        wout_ref = refs[idx]; idx += 1          # (D, vP) bf16
        bout_ref = refs[idx]; idx += 1          # (1, vP) f32 (-1e30 on padded lanes)
        out_ref = refs[idx]; idx += 1           # (1, 1, vP) block of (T, 1, vP)
        h_ref = refs[idx]; idx += 1             # (L, D) carried hidden state
        if lstm:
            c_ref = refs[idx]; idx += 1         # (L, D) carried cell state

        t = pl.program_id(0)

        @pl.when(t == 0)
        def _():                                # seed the carried state from h0/c0
            h_ref[...] = h0_ref[...]
            if lstm:
                c_ref[...] = c0_ref[...]

        # F.relu(dropout(embedding(token)))  (dropout = identity, eval mode)
        x = jnp.maximum(emb_ref[0], 0.0)        # (1, D) f32, padded lanes are 0

        for l in range(num_layers):
            h = h_ref[pl.ds(l, 1), :]           # (1, D)  (previous step's state, row l)

            # two tile-aligned MXU pushes instead of a lane-axis [x|h] concatenate
            pre = (jnp.dot(x.astype(jnp.bfloat16), w_ref[l, :D, :],
                           preferred_element_type=jnp.float32)
                   + jnp.dot(h.astype(jnp.bfloat16), w_ref[l, D:, :],
                             preferred_element_type=jnp.float32)
                   + b_ref[pl.ds(l, 1), :])     # (1, nP)

            if rnn_type == "RNN":
                h_new = jnp.tanh(pre)           # nP == D
            elif rnn_type == "GRU":             # packed gate order [r, z, n_x, n_h]
                sg = jax.nn.sigmoid(pre[:, 0:2 * D])        # one wide EUP pass
                r = sg[:, 0:D]
                z = sg[:, D:2 * D]
                n = jnp.tanh(pre[:, 2 * D:3 * D] + r * pre[:, 3 * D:4 * D])
                h_new = (1.0 - z) * n + z * h
            else:                               # LSTM, packed gate order [i, f, o, g]
                c = c_ref[pl.ds(l, 1), :]
                sg = jax.nn.sigmoid(pre[:, 0:3 * D])        # one wide EUP pass
                i_g = sg[:, 0:D]
                f_g = sg[:, D:2 * D]
                o_g = sg[:, 2 * D:3 * D]
                g_g = jnp.tanh(pre[:, 3 * D:4 * D])
                c_new = f_g * c + i_g * g_g
                h_new = o_g * jnp.tanh(c_new)
                c_ref[pl.ds(l, 1), :] = c_new   # lane-dense (1, D) store

            h_ref[pl.ds(l, 1), :] = h_new       # lane-dense (1, D) store
            x = h_new                           # inter-layer dropout = identity (eval)

        # out[t] = log_softmax(x @ W_out + b_out); padded vocab lanes have bias -1e30 so
        # exp() underflows to 0 and they drop out of the normalization (epilogue kept f32).
        logits = jnp.dot(x.astype(jnp.bfloat16), wout_ref[...],
                         preferred_element_type=jnp.float32) + bout_ref[...]
        m = jnp.max(logits, axis=1, keepdims=True)
        s = logits - m
        lse = jnp.log(jnp.sum(jnp.exp(s), axis=1, keepdims=True))
        out_ref[0] = s - lse

    return kernel


class PallasDecoder:
    """JAX/Pallas port of the PyTorch Decoder module (deterministic synthetic init)."""

    def __init__(self, rnn_type, out_size, embed_size, hid_size, p, num_layers, key):
        assert rnn_type in GATE_MULT
        self.rnn_type = rnn_type
        self.out_size = out_size
        self.embed_size = embed_size
        self.hid_size = hid_size
        self.num_layers = num_layers
        self.p = p  # dropout prob (unused: eval-mode identity)

        H = hid_size
        G = GATE_MULT[rnn_type]
        Ge = EFF_GATES[rnn_type]
        # 128-aligned lane width for x / h / each gate block -> every slice is tile-aligned
        self.dp = _round_up(max(embed_size, hid_size), 128)
        self.n_pad = Ge * self.dp
        self.v_pad = _round_up(out_size, 128)

        k_emb, k_rnn, k_out = jax.random.split(key, 3)

        # nn.Embedding(out_size, embed_size): N(0,1); stored (V, 1, Dp), zero-padded, so
        # the scalar-prefetch index_map can DMA exactly one lane-dense row into the kernel.
        emb = jax.random.normal(k_emb, (out_size, embed_size), jnp.float32)
        emb = jnp.pad(emb, ((0, 0), (0, self.dp - embed_size)))
        self.emb_table = emb.reshape(out_size, 1, self.dp)

        # Recurrent stack (PyTorch layout: weight_ih (G*H, in), weight_hh (G*H, H)),
        # fused host-side into one stacked (L, 2*Dp, n_pad) weight + (L, n_pad) bias.
        bound = 1.0 / math.sqrt(H)
        w_blocks, b_blocks = [], []
        for l in range(num_layers):
            in_l = embed_size if l == 0 else hid_size
            k_rnn, k1, k2, k3, k4 = jax.random.split(k_rnn, 5)
            w_ih = jax.random.uniform(k1, (G * H, in_l), jnp.float32, -bound, bound)
            w_hh = jax.random.uniform(k2, (G * H, H), jnp.float32, -bound, bound)
            b_ih = jax.random.uniform(k3, (G * H,), jnp.float32, -bound, bound)
            b_hh = jax.random.uniform(k4, (G * H,), jnp.float32, -bound, bound)
            W, b = self._pack_layer(w_ih, w_hh, b_ih, b_hh, in_l)
            w_blocks.append(W)
            b_blocks.append(b)
        self.w_all = jnp.stack(w_blocks).astype(jnp.bfloat16)   # (L, 2*Dp, n_pad)
        self.b_all = jnp.stack(b_blocks)                        # (L, n_pad) f32

        # nn.Linear(hid_size, out_size) with the vocab axis padded to a multiple of 128.
        k_out, k1, k2 = jax.random.split(k_out, 3)
        w_out = jax.random.uniform(k1, (out_size, H), jnp.float32, -bound, bound)
        b_out = jax.random.uniform(k2, (out_size,), jnp.float32, -bound, bound)
        w_out_p = jnp.zeros((self.dp, self.v_pad), jnp.float32).at[:H, :out_size].set(w_out.T)
        b_out_p = jnp.full((1, self.v_pad), _NEG, jnp.float32).at[0, :out_size].set(b_out)
        self.w_out_p = w_out_p.astype(jnp.bfloat16)
        self.b_out_p = b_out_p

        self._kernel = make_decoder_kernel(rnn_type, num_layers, self.dp)

    def _pack_layer(self, w_ih, w_hh, b_ih, b_hh, in_l):
        """Fuse one layer's PyTorch gate weights into a (2*Dp, n_pad) block:
        rows [0:Dp] = x-weights, rows [Dp:2*Dp] = h-weights, each gate padded to Dp lanes."""
        H, Dp = self.hid_size, self.dp
        rt = self.rnn_type
        sl = lambda a, g: a[g * H:(g + 1) * H]
        if rt == "RNN":
            blocks = [(sl(w_ih, 0).T, sl(w_hh, 0).T, sl(b_ih, 0) + sl(b_hh, 0))]
        elif rt == "LSTM":
            order = (0, 1, 3, 2)          # PyTorch [i,f,g,o] -> packed [i,f,o,g]
            blocks = [(sl(w_ih, g).T, sl(w_hh, g).T, sl(b_ih, g) + sl(b_hh, g))
                      for g in order]
        else:  # GRU packed as [r, z, n_x, n_h] (n keeps its h-part separate)
            blocks = [(sl(w_ih, 0).T, sl(w_hh, 0).T, sl(b_ih, 0) + sl(b_hh, 0)),
                      (sl(w_ih, 1).T, sl(w_hh, 1).T, sl(b_ih, 1) + sl(b_hh, 1)),
                      (sl(w_ih, 2).T, None, sl(b_ih, 2)),
                      (None, sl(w_hh, 2).T, sl(b_hh, 2))]
        W = jnp.zeros((2 * Dp, self.n_pad), jnp.float32)
        b = jnp.zeros((self.n_pad,), jnp.float32)
        for g, (wx, wh, bias) in enumerate(blocks):
            c0 = g * Dp
            if wx is not None:
                W = W.at[:in_l, c0:c0 + H].set(wx)
            if wh is not None:
                W = W.at[Dp:Dp + H, c0:c0 + H].set(wh)
            b = b.at[c0:c0 + H].set(bias)
        return W, b

    def init_hidden(self):
        z = jnp.zeros((self.num_layers, 1, self.hid_size), jnp.float32)
        if self.rnn_type == "LSTM":
            return (z, z)
        return z

    @functools.partial(jax.jit, static_argnums=0)
    def _decode_jit(self, tokens, hidden):
        L, H, Dp = self.num_layers, self.hid_size, self.dp
        T = tokens.shape[0]
        lstm = self.rnn_type == "LSTM"

        def pad_state(s):                       # (L,1,H) -> lane-dense (L, Dp)
            s2 = s.reshape(L, H).astype(jnp.float32)
            return jnp.pad(s2, ((0, 0), (0, Dp - H)))

        if lstm:
            h0, c0 = hidden
            state = (pad_state(h0), pad_state(c0))
        else:
            state = (pad_state(hidden),)

        state_spec = pl.BlockSpec((L, Dp), lambda t, tok: (0, 0))
        const3 = lambda t, tok: (0, 0, 0)
        const2 = lambda t, tok: (0, 0)

        in_specs = [
            # one embedding row per step, selected via the scalar-prefetch token array
            pl.BlockSpec((1, 1, Dp), lambda t, tok: (tok[t], 0, 0)),
            state_spec,
        ]
        if lstm:
            in_specs.append(state_spec)
        # constant index_maps -> DMA'd once, VMEM-resident for all T steps
        in_specs += [
            pl.BlockSpec((L, 2 * Dp, self.n_pad), const3),
            pl.BlockSpec((L, self.n_pad), const2),
            pl.BlockSpec((Dp, self.v_pad), const2),
            pl.BlockSpec((1, self.v_pad), const2),
        ]

        out_specs = [pl.BlockSpec((1, 1, self.v_pad), lambda t, tok: (t, 0, 0)),
                     state_spec]
        out_shapes = [jax.ShapeDtypeStruct((T, 1, self.v_pad), jnp.float32),
                      jax.ShapeDtypeStruct((L, Dp), jnp.float32)]
        # alias h0 (and c0) with the new-state outputs; indices count the prefetch operand
        # (validated layout).  The aliased operands are jit intermediates -> no copy.
        aliases = {2: 1}
        if lstm:
            out_specs.append(state_spec)
            out_shapes.append(jax.ShapeDtypeStruct((L, Dp), jnp.float32))
            aliases[3] = 2

        results = pl.pallas_call(
            self._kernel,
            out_shape=tuple(out_shapes),
            grid_spec=pltpu.PrefetchScalarGridSpec(
                num_scalar_prefetch=1,
                grid=(T,),
                in_specs=in_specs,
                out_specs=tuple(out_specs),
            ),
            input_output_aliases=aliases,
            compiler_params=pltpu.CompilerParams(
                dimension_semantics=("arbitrary",),      # steps are sequential (state carry)
                vmem_limit_bytes=32 * 1024 * 1024),
        )(tokens, self.emb_table, *state,
          self.w_all, self.b_all, self.w_out_p, self.b_out_p)

        out = results[0][:, 0, :self.out_size]            # (T, out_size) log-probs
        h_new = results[1][:, :H].reshape(L, 1, H)
        if lstm:
            c_new = results[2][:, :H].reshape(L, 1, H)
            return out, (h_new, c_new)
        return out, h_new

    def forward(self, input_token, hidden):
        """Single step — matches the PyTorch module's forward(input, hidden)."""
        tokens = jnp.asarray(input_token, jnp.int32).reshape(1)
        return self._decode_jit(tokens, hidden)

    def forward_sequence(self, tokens, hidden):
        """Amortized multi-step decode (teacher-forced token sequence): one pallas_call,
        weights DMA'd once; returns per-step log-probs (T, out_size) and final hidden."""
        tokens = jnp.asarray(tokens, jnp.int32).reshape(-1)
        return self._decode_jit(tokens, hidden)


if __name__ == "__main__":
    OUT_SIZE = 16      # vocab
    EMBED_SIZE = 32
    HID_SIZE = 32
    NUM_LAYERS = 2
    P_DROP = 0.1
    SEQ_LEN = 8

    key = jax.random.PRNGKey(0)

    for rnn_type in ("RNN", "GRU", "LSTM"):
        key, k_init, k_tok = jax.random.split(key, 3)
        dec = PallasDecoder(rnn_type, OUT_SIZE, EMBED_SIZE, HID_SIZE, P_DROP,
                            NUM_LAYERS, k_init)
        hidden = dec.init_hidden()

        # --- single-step forward (PyTorch-equivalent interface) ---
        token = jnp.array([3], dtype=jnp.int32)
        out, new_hidden = dec.forward(token, hidden)
        jax.block_until_ready(out)
        assert out.shape == (1, OUT_SIZE)
        assert abs(float(jnp.sum(jnp.exp(out[0]))) - 1.0) < 1e-4
        if rnn_type == "LSTM":
            jax.block_until_ready(new_hidden[0]); jax.block_until_ready(new_hidden[1])
            assert new_hidden[0].shape == (NUM_LAYERS, 1, HID_SIZE)
            assert new_hidden[1].shape == (NUM_LAYERS, 1, HID_SIZE)
        else:
            jax.block_until_ready(new_hidden)
            assert new_hidden.shape == (NUM_LAYERS, 1, HID_SIZE)

        # --- amortized multi-step decode over a time-step grid ---
        tokens = jax.random.randint(k_tok, (SEQ_LEN,), 0, OUT_SIZE, dtype=jnp.int32)
        seq_out, seq_hidden = dec.forward_sequence(tokens, hidden)
        jax.block_until_ready(seq_out)
        assert seq_out.shape == (SEQ_LEN, OUT_SIZE)
        for t in range(SEQ_LEN):
            assert abs(float(jnp.sum(jnp.exp(seq_out[t]))) - 1.0) < 1e-4

        # consistency: the T-step kernel must match stepping the 1-step kernel
        hid = hidden
        step_rows = []
        for t in range(SEQ_LEN):
            o, hid = dec.forward(tokens[t], hid)
            step_rows.append(o)
        step_out = jnp.concatenate(step_rows, axis=0)
        assert jnp.allclose(step_out, seq_out, atol=1e-4), rnn_type
        if rnn_type == "LSTM":
            assert jnp.allclose(hid[0], seq_hidden[0], atol=1e-4)
            assert jnp.allclose(hid[1], seq_hidden[1], atol=1e-4)
        else:
            assert jnp.allclose(hid, seq_hidden, atol=1e-4)

    print("KERNEL_OK")
</pallas_src>

<mosaic_0001>
module attributes {stable_mosaic.version = 11 : i64} {
  func.func @kernel(%arg0: i32, %arg1: memref<1xi32, #tpu.memory_space<smem>>, %arg2: memref<1x1x128xf32, #tpu.memory_space<vmem>>, %arg3: memref<2x128xf32, #tpu.memory_space<vmem>>, %arg4: memref<2x256x128xbf16, #tpu.memory_space<vmem>>, %arg5: memref<2x128xf32, #tpu.memory_space<vmem>>, %arg6: memref<128x128xbf16, #tpu.memory_space<vmem>>, %arg7: memref<1x128xf32, #tpu.memory_space<vmem>>, %arg8: memref<1x1x128xf32, #tpu.memory_space<vmem>>, %arg9: memref<2x128xf32, #tpu.memory_space<vmem>>) attributes {dimension_semantics = [#tpu.dimension_semantics<arbitrary>], iteration_bounds = array<i64: 1>, scalar_prefetch = 1 : i64, scratch_operands = 0 : i64, tpu.core_type = #tpu.core_type<tc>, window_params = [{transform_indices = @transform_0, window_bounds = array<i64: 1, 1, 128>}, {pipeline_mode = #tpu.pipeline_mode<synchronous>, transform_indices = @transform_1, window_bounds = array<i64: 2, 128>}, {pipeline_mode = #tpu.pipeline_mode<synchronous>, transform_indices = @transform_2, window_bounds = array<i64: 2, 256, 128>}, {pipeline_mode = #tpu.pipeline_mode<synchronous>, transform_indices = @transform_3, window_bounds = array<i64: 2, 128>}, {pipeline_mode = #tpu.pipeline_mode<synchronous>, transform_indices = @transform_4, window_bounds = array<i64: 128, 128>}, {pipeline_mode = #tpu.pipeline_mode<synchronous>, transform_indices = @transform_5, window_bounds = array<i64: 1, 128>}, {transform_indices = @transform_6, window_bounds = array<i64: 1, 1, 128>}, {pipeline_mode = #tpu.pipeline_mode<synchronous>, transform_indices = @transform_7, window_bounds = array<i64: 2, 128>}]} {
    %c0_i32 = arith.constant 0 : i32
    %0 = arith.cmpi eq, %arg0, %c0_i32 : i32
    %1 = arith.extui %0 : i1 to i32
    %c0_i32_0 = arith.constant 0 : i32
    %2 = arith.cmpi ne, %1, %c0_i32_0 : i32
    scf.if %2 {
      %c0_39 = arith.constant 0 : index
      %c0_40 = arith.constant 0 : index
      %53 = vector.load %arg3[%c0_39, %c0_40] : memref<2x128xf32, #tpu.memory_space<vmem>>, vector<2x128xf32>
      %c0_41 = arith.constant 0 : index
      %c0_42 = arith.constant 0 : index
      %54 = vector.load %arg9[%c0_41, %c0_42] : memref<2x128xf32, #tpu.memory_space<vmem>>, vector<2x128xf32>
      tpu.vector_store %arg9[%c0_41, %c0_42], %53 {strides = array<i32>} : memref<2x128xf32, #tpu.memory_space<vmem>>, vector<2x128xf32>,
    } else {
    }
    %c0 = arith.constant 0 : index
    %c0_1 = arith.constant 0 : index
    %c0_2 = arith.constant 0 : index
    %3 = vector.load %arg2[%c0, %c0_1, %c0_2] : memref<1x1x128xf32, #tpu.memory_space<vmem>>, vector<1x1x128xf32>
    %4 = vector.shape_cast %3 : vector<1x1x128xf32> to vector<1x128xf32>
    %cst = arith.constant 0.000000e+00 : f32
    %5 = vector.broadcast %cst : f32 to vector<1x128xf32>
    %6 = arith.maximumf %4, %5 : vector<1x128xf32>
    %c0_3 = arith.constant 0 : index
    %c0_4 = arith.constant 0 : index
    %7 = vector.load %arg9[%c0_3, %c0_4] : memref<2x128xf32, #tpu.memory_space<vmem>>, vector<1x128xf32>
    %8 = arith.truncf %6 : vector<1x128xf32> to vector<1x128xbf16>
    %c0_5 = arith.constant 0 : index
    %c0_6 = arith.constant 0 : index
    %c0_7 = arith.constant 0 : index
    %9 = vector.load %arg4[%c0_5, %c0_6, %c0_7] : memref<2x256x128xbf16, #tpu.memory_space<vmem>>, vector<1x128x128xbf16>
    %10 = vector.shape_cast %9 : vector<1x128x128xbf16> to vector<128x128xbf16>
    %cst_8 = arith.constant dense<0.000000e+00> : vector<1x128xf32>
    %11 = tpu.matmul %8, %10, %cst_8 {dimension_numbers = #tpu.dot_dimension_numbers<[1], [0], [0], [1], [0, 0, 1, 1], [], []>} : vector<1x128xbf16>, vector<128x128xbf16>, vector<1x128xf32> -> vector<1x128xf32>
    %12 = arith.truncf %7 : vector<1x128xf32> to vector<1x128xbf16>
    %c0_9 = arith.constant 0 : index
    %c128 = arith.constant 128 : index
    %c0_10 = arith.constant 0 : index
    %13 = vector.load %arg4[%c0_9, %c128, %c0_10] : memref<2x256x128xbf16, #tpu.memory_space<vmem>>, vector<1x128x128xbf16>
    %14 = vector.shape_cast %13 : vector<1x128x128xbf16> to vector<128x128xbf16>
    %cst_11 = arith.constant dense<0.000000e+00> : vector<1x128xf32>
    %15 = tpu.matmul %12, %14, %cst_11 {dimension_numbers = #tpu.dot_dimension_numbers<[1], [0], [0], [1], [0, 0, 1, 1], [], []>} : vector<1x128xbf16>, vector<128x128xbf16>, vector<1x128xf32> -> vector<1x128xf32>
    %16 = arith.addf %11, %15 : vector<1x128xf32>
    %c0_12 = arith.constant 0 : index
    %c0_13 = arith.constant 0 : index
    %17 = vector.load %arg5[%c0_12, %c0_13] : memref<2x128xf32, #tpu.memory_space<vmem>>, vector<1x128xf32>
    %18 = arith.addf %16, %17 : vector<1x128xf32>
    %19 = math.tanh %18 : vector<1x128xf32>
    %c0_14 = arith.constant 0 : index
    %c0_15 = arith.constant 0 : index
    %20 = vector.load %arg9[%c0_14, %c0_15] : memref<2x128xf32, #tpu.memory_space<vmem>>, vector<1x128xf32>
    tpu.vector_store %arg9[%c0_14, %c0_15], %19 {strides = array<i32>} : memref<2x128xf32, #tpu.memory_space<vmem>>, vector<1x128xf32>,
    %c1 = arith.constant 1 : index
    %c0_16 = arith.constant 0 : index
    %21 = vector.load %arg9[%c1, %c0_16] : memref<2x128xf32, #tpu.memory_space<vmem>>, vector<1x128xf32>
    %22 = arith.truncf %19 : vector<1x128xf32> to vector<1x128xbf16>
    %c1_17 = arith.constant 1 : index
    %c0_18 = arith.constant 0 : index
    %c0_19 = arith.constant 0 : index
    %23 = vector.load %arg4[%c1_17, %c0_18, %c0_19] : memref<2x256x128xbf16, #tpu.memory_space<vmem>>, vector<1x128x128xbf16>
    %24 = vector.shape_cast %23 : vector<1x128x128xbf16> to vector<128x128xbf16>
    %cst_20 = arith.constant dense<0.000000e+00> : vector<1x128xf32>
    %25 = tpu.matmul %22, %24, %cst_20 {dimension_numbers = #tpu.dot_dimension_numbers<[1], [0], [0], [1], [0, 0, 1, 1], [], []>} : vector<1x128xbf16>, vector<128x128xbf16>, vector<1x128xf32> -> vector<1x128xf32>
    %26 = arith.truncf %21 : vector<1x128xf32> to vector<1x128xbf16>
    %c1_21 = arith.constant 1 : index
    %c128_22 = arith.constant 128 : index
    %c0_23 = arith.constant 0 : index
    %27 = vector.load %arg4[%c1_21, %c128_22, %c0_23] : memref<2x256x128xbf16, #tpu.memory_space<vmem>>, vector<1x128x128xbf16>
    %28 = vector.shape_cast %27 : vector<1x128x128xbf16> to vector<128x128xbf16>
    %cst_24 = arith.constant dense<0.000000e+00> : vector<1x128xf32>
    %29 = tpu.matmul %26, %28, %cst_24 {dimension_numbers = #tpu.dot_dimension_numbers<[1], [0], [0], [1], [0, 0, 1, 1], [], []>} : vector<1x128xbf16>, vector<128x128xbf16>, vector<1x128xf32> -> vector<1x128xf32>
    %30 = arith.addf %25, %29 : vector<1x128xf32>
    %c1_25 = arith.constant 1 : index
    %c0_26 = arith.constant 0 : index
    %31 = vector.load %arg5[%c1_25, %c0_26] : memref<2x128xf32, #tpu.memory_space<vmem>>, vector<1x128xf32>
    %32 = arith.addf %30, %31 : vector<1x128xf32>
    %33 = math.tanh %32 : vector<1x128xf32>
    %c1_27 = arith.constant 1 : index
    %c0_28 = arith.constant 0 : index
    %34 = vector.load %arg9[%c1_27, %c0_28] : memref<2x128xf32, #tpu.memory_space<vmem>>, vector<1x128xf32>
    tpu.vector_store %arg9[%c1_27, %c0_28], %33 {strides = array<i32>} : memref<2x128xf32, #tpu.memory_space<vmem>>, vector<1x128xf32>,
    %35 = arith.truncf %33 : vector<1x128xf32> to vector<1x128xbf16>
    %c0_29 = arith.constant 0 : index
    %c0_30 = arith.constant 0 : index
    %36 = vector.load %arg6[%c0_29, %c0_30] : memref<128x128xbf16, #tpu.memory_space<vmem>>, vector<128x128xbf16>
    %cst_31 = arith.constant dense<0.000000e+00> : vector<1x128xf32>
    %37 = tpu.matmul %35, %36, %cst_31 {dimension_numbers = #tpu.dot_dimension_numbers<[1], [0], [0], [1], [0, 0, 1, 1], [], []>} : vector<1x128xbf16>, vector<128x128xbf16>, vector<1x128xf32> -> vector<1x128xf32>
    %c0_32 = arith.constant 0 : index
    %c0_33 = arith.constant 0 : index
    %38 = vector.load %arg7[%c0_32, %c0_33] : memref<1x128xf32, #tpu.memory_space<vmem>>, vector<1x128xf32>
    %39 = arith.addf %37, %38 : vector<1x128xf32>
    %cst_34 = arith.constant dense<0xFF800000> : vector<1xf32>
    %40 = vector.multi_reduction <maximumf>, %39, %cst_34 [1] : vector<1x128xf32> to vector<1xf32>
    %41 = vector.shape_cast %40 : vector<1xf32> to vector<1x1xf32>
    %42 = vector.broadcast %41 : vector<1x1xf32> to vector<1x128xf32>
    %43 = arith.subf %39, %42 : vector<1x128xf32>
    %44 = math.exp %43 : vector<1x128xf32>
    %cst_35 = arith.constant dense<0.000000e+00> : vector<1xf32>
    %45 = vector.multi_reduction <add>, %44, %cst_35 [1] : vector<1x128xf32> to vector<1xf32>
    %46 = vector.shape_cast %45 : vector<1xf32> to vector<1x1xf32>
    %47 = math.log %46 : vector<1x1xf32>
    %48 = vector.broadcast %47 : vector<1x1xf32> to vector<1x128xf32>
    %49 = arith.subf %43, %48 : vector<1x128xf32>
    %c0_36 = arith.constant 0 : index
    %c0_37 = arith.constant 0 : index
    %c0_38 = arith.constant 0 : index
    %50 = vector.load %arg8[%c0_36, %c0_37, %c0_38] : memref<1x1x128xf32, #tpu.memory_space<vmem>>, vector<1x1x128xf32>
    %51 = vector.shape_cast %50 : vector<1x1x128xf32> to vector<1x128xf32>
    %52 = vector.shape_cast %49 : vector<1x128xf32> to vector<1x1x128xf32>
    tpu.vector_store %arg8[%c0_36, %c0_37, %c0_38], %52 {strides = array<i32>} : memref<1x1x128xf32, #tpu.memory_space<vmem>>, vector<1x1x128xf32>,
    return
  }
  func.func @transform_0(%arg0: i32, %arg1: memref<1xi32, #tpu.memory_space<smem>>) -> (i32, i32, i32) {
    %0 = arith.index_cast %arg0 : i32 to index
    %1 = memref.load %arg1[%0] : memref<1xi32, #tpu.memory_space<smem>>
    %c0_i32 = arith.constant 0 : i32
    %c0_i32_0 = arith.constant 0 : i32
    %c0_i32_1 = arith.constant 0 : i32
    return %1, %c0_i32, %c0_i32_0 : i32, i32, i32
  }
  func.func @transform_1(%arg0: i32, %arg1: memref<1xi32, #tpu.memory_space<smem>>) -> (i32, i32) {
    %c0_i32 = arith.constant 0 : i32
    %c0_i32_0 = arith.constant 0 : i32
    %c0_i32_1 = arith.constant 0 : i32
    return %c0_i32, %c0_i32_0 : i32, i32
  }
  func.func @transform_2(%arg0: i32, %arg1: memref<1xi32, #tpu.memory_space<smem>>) -> (i32, i32, i32) {
    %c0_i32 = arith.constant 0 : i32
    %c0_i32_0 = arith.constant 0 : i32
    %c0_i32_1 = arith.constant 0 : i32
    %c0_i32_2 = arith.constant 0 : i32
    return %c0_i32, %c0_i32_0, %c0_i32_1 : i32, i32, i32
  }
  func.func @transform_3(%arg0: i32, %arg1: memref<1xi32, #tpu.memory_space<smem>>) -> (i32, i32) {
    %c0_i32 = arith.constant 0 : i32
    %c0_i32_0 = arith.constant 0 : i32
    %c0_i32_1 = arith.constant 0 : i32
    return %c0_i32, %c0_i32_0 : i32, i32
  }
  func.func @transform_4(%arg0: i32, %arg1: memref<1xi32, #tpu.memory_space<smem>>) -> (i32, i32) {
    %c0_i32 = arith.constant 0 : i32
    %c0_i32_0 = arith.constant 0 : i32
    %c0_i32_1 = arith.constant 0 : i32
    return %c0_i32, %c0_i32_0 : i32, i32
  }
  func.func @transform_5(%arg0: i32, %arg1: memref<1xi32, #tpu.memory_space<smem>>) -> (i32, i32) {
    %c0_i32 = arith.constant 0 : i32
    %c0_i32_0 = arith.constant 0 : i32
    %c0_i32_1 = arith.constant 0 : i32
    return %c0_i32, %c0_i32_0 : i32, i32
  }
  func.func @transform_6(%arg0: i32, %arg1: memref<1xi32, #tpu.memory_space<smem>>) -> (i32, i32, i32) {
    %c0_i32 = arith.constant 0 : i32
    %c0_i32_0 = arith.constant 0 : i32
    %c0_i32_1 = arith.constant 0 : i32
    return %arg0, %c0_i32, %c0_i32_0 : i32, i32, i32
  }
  func.func @transform_7(%arg0: i32, %arg1: memref<1xi32, #tpu.memory_space<smem>>) -> (i32, i32) {
    %c0_i32 = arith.constant 0 : i32
    %c0_i32_0 = arith.constant 0 : i32
    %c0_i32_1 = arith.constant 0 : i32
    return %c0_i32, %c0_i32_0 : i32, i32
  }
}

</mosaic_0001>

<bundles_post_ra>
// kernel: _decode_jit.1
= control target key start
LH: loop header
LB: loop body
LE: loop exit
PB: predicated region body
PF: predicated region fallthrough
CT: control target
= control target key end

     0   :  { %15 = vsyncpa [#allocation5], 0  ;;  %s1093_s0 = inlined_call_operand.<no memory space> [shape: s32[1], index: 0, kind: input, shape index: {}]   ;;  %s1094_s1 = inlined_call_operand.vmem [shape: f32[16,1,128], index: 1, kind: input, shape index: {}]   ;;  %s1095_s2 = inlined_call_operand.vmem [shape: f32[2,128], index: 2, kind: input, shape index: {}, may-alias: {2,8}]   ;;  %s1096_s3 = inlined_call_operand.hbm [shape: bf16[2,256,128], index: 3, kind: input, shape index: {}]   ;;  %s1097_s4 = inlined_call_operand.vmem [shape: f32[2,128], index: 4, kind: input, shape index: {}]   ;;  %s1098_s5 = inlined_call_operand.hbm [shape: bf16[128,128], index: 5, kind: input, shape index: {}]   ;;  %s1099_s6 = inlined_call_operand.vmem [shape: f32[1,128], index: 6, kind: input, shape index: {}]   ;;  %s1100_s7 = inlined_call_operand.vmem [shape: f32[1,1,128], index: 7, kind: output, shape index: {0}]   ;;  %s1101_s8 = inlined_call_operand.vmem [shape: f32[2,128], index: 8, kind: output, shape index: {1}, may-alias: {2,8}]  }
   0x1   :  { %16 = vsyncpa [#allocation7], 0  ;;  %s929_s27 = smov [#allocation4]   ;;  %s881_s9 = scalar_lea.hbm %s1096_s3, 4096 }
   0x2   :  { %s31_s28 = sshll.u32 %s929_s27, 4  ;;  %p882_p0 = scmp.ne.s32.totalorder %s1096_s3, %s881_s9  ;;  %s32_s28 = int_to_ptr.vmem [resolvable:$true] %s31_s28 }
   0x3   :  { %p885_p1 = scmp.lt.u32.totalorder %s881_s9, %s1096_s3 }
   0x5   :  { %p887_p2 = pnand %p885_p1, %p882_p0 }
   0x7   :  { %890 = shalt.err (!%p887_p2)
}
   0x8   :  { %s891_s14 = scalar_lea.vmem %s32_s28, 4096  ;;  %p896_p4 = scmp.lt.s32.totalorder %s32_s28, %s32_s28 }
   0x9   :  { %p892_p3 = scmp.ne.s32.totalorder %s32_s28, %s891_s14  ;;  %p897_p5 = scmp.lt.s32.totalorder %s891_s14, %s891_s14 }
   0xb   :  { %p898_p6 = por %p897_p5, %p896_p4 }
   0xd   :  { %p899_p7 = pnand %p898_p6, %p892_p3 }
   0xf   :  { %902 = shalt.err (!%p899_p7)
}
  0x10   :  { %s930_s15 = smov 64   ;;  %s931_s16 = smov 4  }
  0x11   :  { %37 = dma.hbm_to_vmem [thread:$0]  %s1096_s3, 4096, %s32_s28, [#allocation5], %s930_s15, %s930_s15, %s931_s16  }
  0x12   :  { %s932_s19 = smov [#allocation6]   ;;  %s903_s23 = scalar_lea.hbm %s1098_s5, 1024 }
  0x13   :  { %s45_s20 = sshll.u32 %s932_s19, 4  ;;  %p904_p8 = scmp.ne.s32.totalorder %s1098_s5, %s903_s23  ;;  %s46_s20 = int_to_ptr.vmem [resolvable:$true] %s45_s20 }
  0x14   :  { %p907_p9 = scmp.lt.u32.totalorder %s903_s23, %s1098_s5 }
  0x16   :  { %p909_p10 = pnand %p907_p9, %p904_p8 }
  0x18   :  { %912 = shalt.err (!%p909_p10)
}
  0x19   :  { %s913_s29 = scalar_lea.vmem %s46_s20, 1024  ;;  %p918_p12 = scmp.lt.s32.totalorder %s46_s20, %s46_s20 }
  0x1a   :  { %p914_p11 = scmp.ne.s32.totalorder %s46_s20, %s913_s29  ;;  %p919_p13 = scmp.lt.s32.totalorder %s913_s29, %s913_s29 }
  0x1c   :  { %p920_p0 = por %p919_p13, %p918_p12 }
  0x1e   :  { %p921_p1 = pnand %p920_p0, %p914_p11 }
  0x20   :  { %924 = shalt.err (!%p921_p1)
}
  0x21   :  { %51 = dma.hbm_to_vmem [thread:$0]  %s1098_s5, 1024, %s46_s20, [#allocation7], %s930_s15, %s930_s15, %s931_s16  }
  0x22   :  { %925 = dma.done.wait [#allocation5], 4096  }
  0x23   :  { %926 = vsyncadd [#allocation5], 4294963200 }
  0x24   :  { %927 = dma.done.wait [#allocation7], 1024  }
  0x25   :  { %928 = vsyncadd [#allocation7], 4294966272  ;;  %v933_v0 = vmov 0.0   ;;  %vm934_vm0 = vmmov 0   ;;  %v833_v1 = vld [vmem:[#allocation4 + $0x40] sm:$0xff]   ;;  %v835_v3 = vld [vmem:[#allocation4 + $0x48] sm:$0xff]  }
  0x26   :  { %727 = vmatprep.subr.bf16.mxu0 %v933_v0  ;;  %747 = vmatprep.subr.bf16.mxu1 %v933_v0  ;;  %v834_v2 = vld [vmem:[#allocation4] sm:$0xff]   ;;  %v836_v4 = vld [vmem:[#allocation4 + $0x8] sm:$0xff]   ;;  %v837_v5 = vld [vmem:[#allocation4 + $0x50] sm:$0xff]   ;;  %p65_p2 = scmp.lt.s32.totalorder %s1093_s0, 15  ;;  %vm615_vm1 = vcmask 1040384  }
  0x27   :  { %743 = vmatprep.mubr.msk.bf16.mxu0 %vm934_vm0, %v933_v0  ;;  %763 = vmatprep.mubr.msk.bf16.mxu1 %vm934_vm0, %v933_v0  ;;  %v838_v6 = vld [vmem:[#allocation4 + $0x10] sm:$0xff]   ;;  %v839_v7 = vld [vmem:[#allocation4 + $0x58] sm:$0xff]   ;;  %v841_v9 = vld [vmem:[#allocation4 + $0x60] sm:$0xff]  }
  0x28   :  { %728 = vmatpush3.bf16.msra.mxu0 %v833_v1  ;;  %748 = vmatpush3.bf16.msra.mxu1 %v834_v2  ;;  %v840_v8 = vld [vmem:[#allocation4 + $0x18] sm:$0xff]   ;;  %s1103_s0 = smov (!%p65_p2, %s1093_s0), 15  ;;  %v842_v10 = vld [vmem:[#allocation4 + $0x20] sm:$0xff]   ;;  %v843_v12 = vld [vmem:[#allocation4 + $0x68] sm:$0xff]  }
  0x29   :  { %729 = vmatprep.subr.bf16.mxu0 %v933_v0  ;;  %749 = vmatprep.subr.bf16.mxu1 %v933_v0  ;;  %v74_v11 = vld [vmem:[%s1095_s2] sm:$0x3]  ;;  %s67_s17 = scalar_lea.vmem %s1094_s1, %s1103_s0  ;;  %v844_v13 = vld [vmem:[#allocation4 + $0x28] sm:$0xff]   ;;  %v845_v15 = vld [vmem:[#allocation4 + $0x70] sm:$0xff]  }
  0x2a   :  { %75 = vst [vmem:[%s1101_s8] sm:$0x3] %v74_v11  ;;  %v76_v14 = vld [vmem:[%s67_s17] sm:$0x1]  ;;  %v846_v16 = vld [vmem:[#allocation4 + $0x30] sm:$0xff]   ;;  %v847_v17 = vld [vmem:[#allocation4 + $0x78] sm:$0xff]  }
  0x2b   :  { %v77_v19 = vmax.f32 %v76_v14, 0.0  ;;  %v848_v20 = vld [vmem:[#allocation4 + $0x38] sm:$0xff]   ;;  %v849_v21 = vld [vmem:[#allocation4 + $0xc0] sm:$0xff]   ;;  %v851_v25 = vld [vmem:[#allocation4 + $0xc8] sm:$0xff]  }
  0x2c   :  { %730 = vmatpush3.bf16.msra.mxu0 %v835_v3  ;;  %750 = vmatpush3.bf16.msra.mxu1 %v836_v4  ;;  %v850_v23 = vld [vmem:[#allocation4 + $0x80] sm:$0xff]   ;;  %v852_v26 = vld [vmem:[#allocation4 + $0x88] sm:$0xff]   ;;  %v853_v27 = vld [vmem:[#allocation4 + $0xd0] sm:$0xff]  }
  0x2d   :  { %731 = vmatprep.subr.bf16.mxu0 %v933_v0  ;;  %751 = vmatprep.subr.bf16.mxu1 %v933_v0  ;;  %v79_v24 = vpack.c.bf16 %v77_v19, %v77_v19  ;;  %v854_v28 = vld [vmem:[#allocation4 + $0x90] sm:$0xff]   ;;  %v855_v29 = vld [vmem:[#allocation4 + $0xd8] sm:$0xff]   ;;  %v857_v31 = vld [vmem:[#allocation4 + $0xe0] sm:$0xff]  }
  0x2e   :  { %v856_v30 = vld [vmem:[#allocation4 + $0x98] sm:$0xff]   ;;  %v858_v32 = vld [vmem:[#allocation4 + $0xa0] sm:$0xff]   ;;  %v859_v33 = vld [vmem:[#allocation4 + $0xe8] sm:$0xff]  }
  0x2f   :  { %v860_v34 = vld [vmem:[#allocation4 + $0xa8] sm:$0xff]   ;;  %v861_v35 = vld [vmem:[#allocation4 + $0xf0] sm:$0xff]   ;;  %v863_v37 = vld [vmem:[#allocation4 + $0xf8] sm:$0xff]  }
  0x30   :  { %732 = vmatpush3.bf16.msra.mxu0 %v837_v5  ;;  %752 = vmatpush3.bf16.msra.mxu1 %v838_v6  ;;  %v862_v36 = vld [vmem:[#allocation4 + $0xb0] sm:$0xff]   ;;  %v864_v40 = vld [vmem:[#allocation4 + $0xb8] sm:$0xff]   ;;  %v865_v41 = vld [vmem:[#allocation6] sm:$0xff]  }
  0x31   :  { %733 = vmatprep.subr.bf16.mxu0 %v933_v0  ;;  %753 = vmatprep.subr.bf16.mxu1 %v933_v0  ;;  %v78_v18 = vld [vmem:[%s1101_s8] sm:$0x1]  ;;  %v293_v38 = vld [vmem:[%s1101_s8 + $0x1] sm:$0x1]  ;;  %v866_v42 = vld [vmem:[#allocation6 + $0x8] sm:$0xff]  }
  0x32   :  { %v96_v22 = vpack.c.bf16 %v78_v18, %v78_v18  ;;  %v312_v39 = vpack.c.bf16 %v293_v38, %v293_v38  ;;  %v867_v43 = vld [vmem:[#allocation6 + $0x10] sm:$0xff]   ;;  %v868_v44 = vld [vmem:[#allocation6 + $0x18] sm:$0xff]   ;;  %v289_v47 = vld [vmem:[%s1097_s4] sm:$0x1] }
  0x33   :  { %v869_v62 = vld [vmem:[#allocation6 + $0x20] sm:$0xff]   ;;  %v870_v63 = vld [vmem:[#allocation6 + $0x28] sm:$0xff]   ;;  %v871_v1 = vld [vmem:[#allocation6 + $0x30] sm:$0xff]  }
  0x34   :  { %734 = vmatpush3.bf16.msra.mxu0 %v839_v7  ;;  %754 = vmatpush3.bf16.msra.mxu1 %v840_v8  ;;  %v872_v2 = vld [vmem:[#allocation6 + $0x38] sm:$0xff]   ;;  %v505_v4 = vld [vmem:[%s1097_s4 + $0x1] sm:$0x1] }
  0x35   :  { %735 = vmatprep.subr.bf16.mxu0 %v933_v0  ;;  %755 = vmatprep.subr.bf16.mxu1 %v933_v0 }
  0x38   :  { %736 = vmatpush3.bf16.msra.mxu0 %v841_v9  ;;  %756 = vmatpush3.bf16.msra.mxu1 %v842_v10 }
  0x39   :  { %737 = vmatprep.subr.bf16.mxu0 %v933_v0  ;;  %757 = vmatprep.subr.bf16.mxu1 %v933_v0 }
  0x3c   :  { %738 = vmatpush3.bf16.msra.mxu0 %v843_v12  ;;  %758 = vmatpush3.bf16.msra.mxu1 %v844_v13 }
  0x3d   :  { %739 = vmatprep.subr.bf16.mxu0 %v933_v0  ;;  %759 = vmatprep.subr.bf16.mxu1 %v933_v0 }
  0x40   :  { %740 = vmatpush3.bf16.msra.mxu0 %v845_v15  ;;  %760 = vmatpush3.bf16.msra.mxu1 %v846_v16 }
  0x41   :  { %741 = vmatprep.subr.bf16.mxu0 %v933_v0  ;;  %761 = vmatprep.subr.bf16.mxu1 %v933_v0 }
  0x44   :  { %742 = vmatpush3.bf16.msra.mxu0 %v847_v17  ;;  %762 = vmatpush3.bf16.msra.mxu1 %v848_v20 }
  0x45   :  { %767 = vmatprep.subr.bf16.mxu0 %v933_v0  ;;  %787 = vmatprep.subr.bf16.mxu1 %v933_v0 }
  0x47   :  { %744 = vmatmul.mubr.bf16.vlgmr.msra.gmra.mrb[0].mxu0 %v96_v22  ;;  %764 = vmatmul.mubr.bf16.vlgmr.msra.gmra.mrb[0].mxu1 %v79_v24 }
  0x48   :  { %768 = vmatpush3.bf16.msra.mxu0 %v849_v21  ;;  %788 = vmatpush3.bf16.msra.mxu1 %v850_v23 }
  0x49   :  { %769 = vmatprep.subr.bf16.mxu0 %v933_v0  ;;  %789 = vmatprep.subr.bf16.mxu1 %v933_v0 }
  0x4a   :  { %783 = vmatprep.mubr.msk.bf16.mxu0 %vm934_vm0, %v933_v0  ;;  %803 = vmatprep.mubr.msk.bf16.mxu1 %vm934_vm0, %v933_v0 }
  0x4c   :  { %770 = vmatpush3.bf16.msra.mxu0 %v851_v25  ;;  %790 = vmatpush3.bf16.msra.mxu1 %v852_v26 }
  0x4d   :  { %771 = vmatprep.subr.bf16.mxu0 %v933_v0  ;;  %791 = vmatprep.subr.bf16.mxu1 %v933_v0 }
  0x50   :  { %772 = vmatpush3.bf16.msra.mxu0 %v853_v27  ;;  %792 = vmatpush3.bf16.msra.mxu1 %v854_v28 }
  0x51   :  { %773 = vmatprep.subr.bf16.mxu0 %v933_v0  ;;  %793 = vmatprep.subr.bf16.mxu1 %v933_v0 }
  0x54   :  { %774 = vmatpush3.bf16.msra.mxu0 %v855_v29  ;;  %794 = vmatpush3.bf16.msra.mxu1 %v856_v30 }
  0x55   :  { %775 = vmatprep.subr.bf16.mxu0 %v933_v0  ;;  %795 = vmatprep.subr.bf16.mxu1 %v933_v0 }
  0x58   :  { %776 = vmatpush3.bf16.msra.mxu0 %v857_v31  ;;  %796 = vmatpush3.bf16.msra.mxu1 %v858_v32 }
  0x59   :  { %777 = vmatprep.subr.bf16.mxu0 %v933_v0  ;;  %797 = vmatprep.subr.bf16.mxu1 %v933_v0 }
  0x5c   :  { %778 = vmatpush3.bf16.msra.mxu0 %v859_v33  ;;  %798 = vmatpush3.bf16.msra.mxu1 %v860_v34 }
  0x5d   :  { %779 = vmatprep.subr.bf16.mxu0 %v933_v0  ;;  %799 = vmatprep.subr.bf16.mxu1 %v933_v0 }
  0x60   :  { %780 = vmatpush3.bf16.msra.mxu0 %v861_v35  ;;  %800 = vmatpush3.bf16.msra.mxu1 %v862_v36 }
  0x61   :  { %781 = vmatprep.subr.bf16.mxu0 %v933_v0  ;;  %801 = vmatprep.subr.bf16.mxu1 %v933_v0 }
  0x64   :  { %782 = vmatpush3.bf16.msra.mxu0 %v863_v37  ;;  %802 = vmatpush3.bf16.msra.mxu1 %v864_v40 }
  0x65   :  { %807 = vmatprep.subr.bf16.mxu0 %v933_v0 }
  0x67   :  { %784 = vmatmul.mubr.bf16.vlgmr.msra.gmra.mrb[4].mxu0 %v312_v39 }
  0x68   :  { %823 = vmatprep.mubr.msk.bf16.mxu0 %vm934_vm0, %v933_v0  ;;  %808 = vmatpush3.bf16.msra.mxu0 %v865_v41 }
  0x69   :  { %809 = vmatprep.subr.bf16.mxu0 %v933_v0 }
  0x6c   :  { %810 = vmatpush3.bf16.msra.mxu0 %v866_v42 }
  0x6d   :  { %811 = vmatprep.subr.bf16.mxu0 %v933_v0 }
  0x70   :  { %812 = vmatpush3.bf16.msra.mxu0 %v867_v43 }
  0x71   :  { %813 = vmatprep.subr.bf16.mxu0 %v933_v0 }
  0x74   :  { %814 = vmatpush3.bf16.msra.mxu0 %v868_v44 }
  0x75   :  { %815 = vmatprep.subr.bf16.mxu0 %v933_v0 }
  0x78   :  { %816 = vmatpush3.bf16.msra.mxu0 %v869_v62 }
  0x79   :  { %817 = vmatprep.subr.bf16.mxu0 %v933_v0 }
  0x7c   :  { %818 = vmatpush3.bf16.msra.mxu0 %v870_v63 }
  0x7d   :  { %819 = vmatprep.subr.bf16.mxu0 %v933_v0 }
  0x80   :  { %820 = vmatpush3.bf16.msra.mxu0 %v871_v1 }
  0x81   :  { %821 = vmatprep.subr.bf16.mxu0 %v933_v0  ;;  %v526_v0 = vld [vmem:[%s1099_s6] sm:$0x1] }
  0x84   :  { %822 = vmatpush3.bf16.msra.mxu0 %v872_v2 }
 0x11a   :  { %v195_v45 = vpop.f32.mrb[0].mxu0  ;;  %v283_v46 = vpop.f32.mrb[0].mxu1 }
 0x11b   :  { %v745_v48 = vpop.f32.mrb[1].mxu0  ;;  %v284_v49 = vadd.f32 %v283_v46, %v195_v45  ;;  %v765_v50 = vpop.f32.mrb[1].mxu1 }
 0x11c   :  { %v198_v51 = vpop.f32.mrb[2].mxu0  ;;  %v286_v52 = vpop.f32.mrb[2].mxu1 }
 0x11d   :  { %v746_v53 = vpop.f32.mrb[3].mxu0  ;;  %v290_v54 = vadd.f32 %v289_v47, %v284_v49  ;;  %v766_v55 = vpop.f32.mrb[3].mxu1 }
 0x11f   :  { %873 = vtanh.f32 %v290_v54 }
 0x129   :  { %v874_v56 = vpop.eup %873 }
 0x12a   :  { %292 = vst [vmem:[%s1101_s8] sm:$0x1] %v874_v56  ;;  %v294_v57 = vpack.c.bf16 %v874_v56, %v874_v56 }
 0x12c   :  { %804 = vmatmul.mubr.bf16.vlgmr.msra.gmra.mrb[4].mxu1 %v294_v57 }
 0x13a   :  { %v411_v58 = vpop.f32.mrb[4].mxu0 }
 0x13b   :  { %v785_v59 = vpop.f32.mrb[5].mxu0 }
 0x13c   :  { %v414_v60 = vpop.f32.mrb[6].mxu0 }
 0x13d   :  { %v786_v61 = vpop.f32.mrb[7].mxu0 }
 0x1ff   :  { %v499_v3 = vpop.f32.mrb[4].mxu1 }
 0x200   :  { %v500_v5 = vadd.f32 %v499_v3, %v411_v58  ;;  %v805_v6 = vpop.f32.mrb[5].mxu1 }
 0x201   :  { %v502_v7 = vpop.f32.mrb[6].mxu1 }
 0x202   :  { %v506_v8 = vadd.f32 %v505_v4, %v500_v5  ;;  %v806_v9 = vpop.f32.mrb[7].mxu1 }
 0x204   :  { %875 = vtanh.f32 %v506_v8 }
 0x20e   :  { %v876_v10 = vpop.eup %875 }
 0x20f   :  { %508 = vst [vmem:[%s1101_s8 + $0x1] sm:$0x1] %v876_v10  ;;  %v509_v11 = vpack.c.bf16 %v876_v10, %v876_v10 }
 0x211   :  { %824 = vmatmul.mubr.bf16.vlgmr.msra.gmra.mrb[8].mxu0 %v509_v11 }
 0x2e4   :  { %v609_v12 = vpop.f32.mrb[8].mxu0 }
 0x2e5   :  { %v610_v13 = vadd.f32 %v609_v12, %v526_v0  ;;  %v825_v14 = vpop.f32.mrb[9].mxu0 }
 0x2e6   :  { %v612_v15 = vpop.f32.mrb[10].mxu0 }
 0x2e7   :  { %v826_v16 = vpop.f32.mrb[11].mxu0  ;;  %v616_v17 = vsel %vm615_vm1, %v610_v13, -inf }
 0x2e8   :  { %617 = vmax.xlane.f32.xlu0 %v616_v17 }
 0x375   :  { %v618_v18 = vpop.xlane.xlu0 %617 }
 0x376   :  { %v619_v19 = vsub.f32 %v610_v13, %v618_v18 }
 0x378   :  { %v620_v20 = vmul.f32 1.442695, %v619_v19 }
 0x37a   :  { %877 = vpow2.f32 %v620_v20 }
 0x384   :  { %v878_v21 = vpop.eup %877 }
 0x385   :  { %v622_v22 = vsel %vm615_vm1, %v878_v21, 0.0 }
 0x386   :  { %623 = vadd.xlane.f32.xlu0 %v622_v22 }
 0x413   :  { %v624_v23 = vpop.xlane.xlu0 %623 }
 0x414   :  { %879 = vlog2.f32 %v624_v23 }
 0x41e   :  { %v880_v24 = vpop.eup %879 }
 0x41f   :  { %v626_v25 = vmul.f32 0.6931472, %v880_v24 }
 0x421   :  { %v627_v26 = vsub.f32 %v619_v19, %v626_v25 }
 0x423   :  { %628 = vst [vmem:[%s1100_s7] sm:$0x1] %v627_v26 }
 0x424   :  { %637 = vsyncpa [#allocation5], 1 }
 0x425   :  { %638 = vsyncpa [#allocation7], 1 }

</bundles_post_ra>
